<compile_context>
chip_gen: v5e
topology: v5e:2x2
jax: 0.10.0
libtpu: 0.0.40
codegen_flags: <defaults>
</compile_context>

<pallas_src>
import functools
import math

import jax
import jax.numpy as jnp
import numpy as np
from jax.experimental import pallas as pl
from jax.experimental.pallas import tpu as pltpu

_SMALL_N_ELEMS = 1 << 16            # below this many output f32s, plain jnp wins
_TARGET_TILE_BYTES = 4 * 1024 * 1024  # ~4 MiB of output per grid step


def _sinusoidal_kernel(x_ref, c_ref, o_ref):
    """x_ref: (T, Kp) packed positions + ones col (+ zero pad).
    c_ref: (Kp, L) constants (masked thetas rows, phase row, zero rows).
    o_ref: (T, L) lane-dense output slab."""
    ang = jnp.dot(x_ref[...], c_ref[...],
                  preferred_element_type=jnp.float32,
                  precision=jax.lax.Precision.HIGHEST)   # tiny MXU matmul, exact-ish
    o_ref[...] = jnp.sin(ang)        # one transcendental per element (phase trick)


def _build_consts(d_model, base, k, Kp, L):
    """(Kp, L) f32: rows 0..k-1 = per-lane-group masked theta, row k = phase."""
    d_half = d_model // 2
    theta = 1.0 / (base ** (2.0 * np.arange(d_half, dtype=np.float64) / d_model))
    theta_rep = np.repeat(theta, 2)                     # [t0,t0,t1,t1,...]
    theta_wide = np.tile(theta_rep, k)                  # (L,)
    lane = np.arange(L)
    group = lane // d_model                             # which packed row owns lane
    consts = np.zeros((Kp, L), dtype=np.float32)
    for j in range(k):
        consts[j] = np.where(group == j, theta_wide, 0.0)
    consts[k] = np.where(lane % 2 == 0, np.pi / 2.0, 0.0)   # cos lanes get +pi/2
    return consts


@functools.partial(jax.jit, static_argnames=("d_model", "base", "force_pallas"))
def sinusoidal_pos_emb(x, d_model, base=100000.0, force_pallas=False):
    """JAX/Pallas equivalent of SinusoidalPosEmb.forward."""
    assert d_model % 2 == 0
    B = x.shape[0]
    x_flat = x.astype(jnp.float32).reshape(-1)          # (N,) positions
    N = x_flat.shape[0]

    # Small-N fast path: a pallas_call costs a few us of launch + DMA latency;
    # fused XLA is strictly faster for tiny timestep embeddings.
    if N * d_model < _SMALL_N_ELEMS and not force_pallas:
        d_half = d_model // 2
        theta = jnp.asarray(
            1.0 / (base ** (2.0 * np.arange(d_half, dtype=np.float64) / d_model)),
            dtype=jnp.float32)
        ang = x_flat[:, None] * theta
        return jnp.stack((jnp.cos(ang), jnp.sin(ang)), axis=-1).reshape(B, -1)

    # Pack k logical positions per kernel row so the lane dim is lane-dense.
    k = 128 // math.gcd(d_model, 128)
    L = k * d_model                                     # = lcm(d_model, 128)
    Kp = ((k + 1 + 7) // 8) * 8                         # contraction dim, 8-aligned

    n_rows = pl.cdiv(N, k)

    # Tile rows by output bytes (~4 MiB/tile), multiple of 8; split into >= 2
    # grid steps on large inputs so both v7x TensorCores get work.
    if n_rows <= 8:
        tile = n_rows                                   # block == full array dims
    else:
        tile = min(max(8, (_TARGET_TILE_BYTES // (L * 4)) // 8 * 8),
                   ((n_rows + 7) // 8) * 8)
        if tile >= n_rows and n_rows >= 256:
            tile = ((((n_rows + 1) // 2) + 7) // 8) * 8
    num_tiles = pl.cdiv(n_rows, tile)                   # ragged last block is masked

    # Packed positions + ones column (drives the phase row) + zero pad to Kp.
    pad = n_rows * k - N
    xr = jnp.pad(x_flat, (0, pad)) if pad else x_flat
    xr = xr.reshape(n_rows, k)
    x2 = jnp.concatenate(
        [xr,
         jnp.ones((n_rows, 1), jnp.float32),
         jnp.zeros((n_rows, Kp - k - 1), jnp.float32)], axis=1)

    consts = jnp.asarray(_build_consts(d_model, base, k, Kp, L))

    # Double-buffered output + input tiles + resident constants, with headroom.
    vmem_need = 2 * tile * L * 4 + 2 * tile * Kp * 4 + Kp * L * 4
    vmem_limit = int(min(32 * 1024 * 1024, max(16 * 1024 * 1024, 2 * vmem_need)))

    out = pl.pallas_call(
        _sinusoidal_kernel,
        out_shape=jax.ShapeDtypeStruct((n_rows, L), jnp.float32),
        grid=(num_tiles,),
        in_specs=[
            pl.BlockSpec((tile, Kp), lambda i: (i, 0)),
            pl.BlockSpec((Kp, L), lambda i: (0, 0)),    # constant -> resident in VMEM
        ],
        out_specs=pl.BlockSpec((tile, L), lambda i: (i, 0)),
        compiler_params=pltpu.CompilerParams(
            dimension_semantics=("parallel",),          # independent rows -> megacore
            vmem_limit_bytes=vmem_limit),
    )(x2, consts)

    # Row-major slab == row-major logical (N, d_model) output.
    flat = out.reshape(-1)
    if pad:
        flat = flat[: N * d_model]                      # only the ragged N % k case
    return flat.reshape(B, -1)


def _reference(x, d_model, base=100000.0):
    B = x.shape[0]
    d_half = d_model // 2
    theta = jnp.asarray(
        1.0 / (base ** (2.0 * np.arange(d_half, dtype=np.float64) / d_model)),
        dtype=jnp.float32)
    ang = x.astype(jnp.float32).reshape(-1, 1) * theta
    return jnp.stack((jnp.cos(ang), jnp.sin(ang)), axis=-1).reshape(B, -1)


if __name__ == "__main__":
    key = jax.random.PRNGKey(0)

    # Typical timestep-embedding shape; force the Pallas path (the auto path
    # would take the small-N jnp fast path here).
    d_model = 32
    B = 8
    x = jax.random.uniform(key, (B,), dtype=jnp.float32, minval=0.0, maxval=100.0)
    out = jax.block_until_ready(
        sinusoidal_pos_emb(x, d_model=d_model, force_pallas=True))
    ref = _reference(x, d_model)
    assert out.shape == (B, d_model), out.shape
    # sin(a + pi/2) vs cos(a) plus HIGHEST-precision matmul rounding: <= ~1e-4
    # for the |a| <= 100 range exercised here.
    assert jnp.allclose(out, ref, atol=1e-4, rtol=1e-4), float(
        jnp.max(jnp.abs(out - ref)))

    # Auto small-N fast path (pure jnp).
    out_fast = jax.block_until_ready(sinusoidal_pos_emb(x, d_model=d_model))
    assert out_fast.shape == (B, d_model)
    assert jnp.allclose(out_fast, ref, atol=1e-5, rtol=1e-5)

    # Ragged N (N % k != 0, masked partial block) and a multi-tile grid case.
    for bb, dm, sub in ((101, 32, 1), (2050, 64, 2)):
        xk = jax.random.uniform(jax.random.fold_in(key, sub), (bb,),
                                dtype=jnp.float32, minval=0.0, maxval=100.0)
        o = jax.block_until_ready(
            sinusoidal_pos_emb(xk, d_model=dm, force_pallas=True))
        r = _reference(xk, dm)
        assert o.shape == (bb, dm), o.shape
        assert jnp.allclose(o, r, atol=1e-4, rtol=1e-4), float(
            jnp.max(jnp.abs(o - r)))

    print("KERNEL_OK")
</pallas_src>

<mosaic_0001>
module attributes {stable_mosaic.version = 11 : i64} {
  func.func @_sinusoidal_kernel(%arg0: i32, %arg1: memref<2x8xf32, #tpu.memory_space<vmem>>, %arg2: memref<8x128xf32, #tpu.memory_space<vmem>>, %arg3: memref<2x128xf32, #tpu.memory_space<vmem>>) attributes {dimension_semantics = [#tpu.dimension_semantics<parallel>], iteration_bounds = array<i64: 1>, scalar_prefetch = 0 : i64, scratch_operands = 0 : i64, tpu.core_type = #tpu.core_type<tc>, window_params = [{transform_indices = @transform_0, window_bounds = array<i64: 2, 8>}, {pipeline_mode = #tpu.pipeline_mode<synchronous>, transform_indices = @transform_1, window_bounds = array<i64: 8, 128>}, {transform_indices = @transform_2, window_bounds = array<i64: 2, 128>}]} {
    %c0 = arith.constant 0 : index
    %c0_0 = arith.constant 0 : index
    %0 = vector.load %arg1[%c0, %c0_0] : memref<2x8xf32, #tpu.memory_space<vmem>>, vector<2x8xf32>
    %c0_1 = arith.constant 0 : index
    %c0_2 = arith.constant 0 : index
    %1 = vector.load %arg2[%c0_1, %c0_2] : memref<8x128xf32, #tpu.memory_space<vmem>>, vector<8x128xf32>
    %cst = arith.constant dense<0.000000e+00> : vector<2x128xf32>
    %2 = tpu.matmul %0, %1, %cst {dimension_numbers = #tpu.dot_dimension_numbers<[1], [0], [0], [1], [0, 0, 1, 1], [], []>, precision = #tpu.contract_precision<fp32>} : vector<2x8xf32>, vector<8x128xf32>, vector<2x128xf32> -> vector<2x128xf32>
    %3 = math.sin %2 : vector<2x128xf32>
    %c0_3 = arith.constant 0 : index
    %c0_4 = arith.constant 0 : index
    %4 = vector.load %arg3[%c0_3, %c0_4] : memref<2x128xf32, #tpu.memory_space<vmem>>, vector<2x128xf32>
    tpu.vector_store %arg3[%c0_3, %c0_4], %3 {strides = array<i32>} : memref<2x128xf32, #tpu.memory_space<vmem>>, vector<2x128xf32>,
    return
  }
  func.func @transform_0(%arg0: i32) -> (i32, i32) {
    %c0_i32 = arith.constant 0 : i32
    %c0_i32_0 = arith.constant 0 : i32
    return %arg0, %c0_i32 : i32, i32
  }
  func.func @transform_1(%arg0: i32) -> (i32, i32) {
    %c0_i32 = arith.constant 0 : i32
    %c0_i32_0 = arith.constant 0 : i32
    %c0_i32_1 = arith.constant 0 : i32
    return %c0_i32, %c0_i32_0 : i32, i32
  }
  func.func @transform_2(%arg0: i32) -> (i32, i32) {
    %c0_i32 = arith.constant 0 : i32
    %c0_i32_0 = arith.constant 0 : i32
    return %arg0, %c0_i32 : i32, i32
  }
}

</mosaic_0001>

<bundles_post_ra>
// kernel: sinusoidal_pos_emb.1
= control target key start
LH: loop header
LB: loop body
LE: loop exit
PB: predicated region body
PF: predicated region fallthrough
CT: control target
= control target key end

     0   :  { %vm13_vm0 = vcmask 64512   ;;  %v333_v35 = vmov 683565275   ;;  %v334_v37 = vmov 2475754826   ;;  %s420_s1 = inlined_call_operand.vmem [shape: f32[8,128], index: 1, kind: input, shape index: {}]   ;;  %s421_s0 = inlined_call_operand.vmem [shape: f32[2,8], index: 0, kind: input, shape index: {}]   ;;  %s422_s2 = inlined_call_operand.vmem [shape: f32[2,128], index: 2, kind: output, shape index: {}]  }
   0x1   :  { %v12_v0 = vld [vmem:[%s420_s1] sm:$0xff]  ;;  %v335_v40 = vmov 2131351028   ;;  %v336_v43 = vmov 2102212464  }
   0x2   :  { %v11_v1 = vld [vmem:[%s421_s0] sm:$0x3]  ;;  %v32_v2 = vand.u32 4294901760, %v12_v0  ;;  %v337_v46 = vmov 920167782  }
   0x3   :  { %v15_v3 = vsel %vm13_vm0, %v11_v1, 0  ;;  %v338_v49 = vmov 1326507024  }
   0x4   :  { %v34_v4 = vand.u32 4294901760, %v15_v3  ;;  %v59_v5 = vsub.f32 %v12_v0, %v32_v2  ;;  %109 = vmatpush.msra.mxu3 %v32_v2  ;;  %33 = vmatpush.msra.mxu0 %v32_v2 }
   0x6   :  { %v35_v6 = vsub.f32 %v15_v3, %v34_v4  ;;  %86 = vmatpush.msra.mxu2 %v59_v5  ;;  %v60_v7 = vand.u32 4294901760, %v59_v5 }
   0x8   :  { %89 = vmatmul.f32.vlgmr.msra.gmra.mxu2 %v35_v6  ;;  %v36_v8 = vand.u32 4294901760, %v35_v6  ;;  %v61_v9 = vsub.f32 %v59_v5, %v60_v7  ;;  %135 = vmatpush.msrb.mxu0 %v60_v7 }
   0xa   :  { %113 = vmatmul.f32.vlgmr.msra.gmra.mxu3 %v36_v8  ;;  %v37_v10 = vsub.f32 %v35_v6, %v36_v8  ;;  %v62_v11 = vand.u32 4294901760, %v61_v9 }
   0xc   :  { %v38_v12 = vand.u32 4294901760, %v37_v10  ;;  %63 = vmatpush.msra.mxu1 %v62_v11 }
   0xd   :  { %65 = vmatmul.f32.vlgmr.msra.gmra.mxu1 %v34_v4 }
   0xe   :  { %39 = vmatmul.f32.vlgmr.msra.gmra.mxu0 %v38_v12  ;;  %157 = vmatpush.msrb.mxu1 %v32_v2 }
  0x15   :  { %159 = vmatmul.f32.vlgmr.msrb.gmra.mxu1 %v34_v4 }
  0x16   :  { %137 = vmatmul.f32.vlgmr.msrb.gmra.mxu0 %v34_v4 }
  0x8a   :  { %v66_v14 = vpop.f32.mrf.mxu1 }
  0x8b   :  { %v40_v13 = vpop.f32.mrf.mxu0  ;;  %v90_v16 = vpop.f32.mrf.mxu2 }
  0x8c   :  { %v67_v15 = vadd.f32 %v66_v14, %v40_v13 }
  0x8d   :  { %v114_v18 = vpop.f32.mrf.mxu3 }
  0x8e   :  { %v91_v17 = vadd.f32 %v90_v16, %v67_v15 }
  0x90   :  { %v115_v19 = vadd.f32 %v114_v18, %v91_v17 }
  0x92   :  { %v160_v21 = vpop.f32.mrf.mxu1 }
  0x93   :  { %v138_v20 = vpop.f32.mrf.mxu0 }
  0x94   :  { %v139_v22 = vadd.f32 %v138_v20, %v115_v19  ;;  %v339_v19 = vmov 0  }
  0x96   :  { %v361_v23 = vadd.f32 %v160_v21, %v139_v22 }
  0x98   :  { %v166_v24 = vand.u32 2139095040, %v361_v23  ;;  %v163_v27 = vand.u32 2147483647, %v361_v23  ;;  %vm165_vm13 = vcmp.lt.s32.totalorder %v361_v23, 0 }
  0x9a   :  { %v167_v25 = vshrl.u32 %v166_v24, 23  ;;  %v170_v29 = vand.u32 8388607, %v163_v27  ;;  %vm164_vm14 = vcmp.le.f32.partialorder %v163_v27, 0.7853982 }
  0x9c   :  { %v323_v26 = vadd.s32 4294967169, %v167_v25  ;;  %v171_v33 = vor.u32 8388608, %v170_v29 }
  0x9e   :  { %v173_v28 = vadd.s32 1, %v323_v26  ;;  %v378_v56 = vshll.u32 %v171_v33, 8 }
  0xa0   :  { %vm174_vm1 = vcmp.gt.s32.totalorder %v173_v28, 0  ;;  %v212_v1 = vand.u32 65535, %v378_v56  ;;  %v213_v2 = vshrl.u32 %v378_v56, 16 }
  0xa1   :  { %v175_v30 = vsel %vm174_vm1, %v173_v28, 0 }
  0xa2   :  { %v177_v31 = vand.u32 31, %v175_v30  ;;  %v369_v34 = vshrl.u32 %v175_v30, 5 }
  0xa4   :  { %v367_v32 = vsub.s32 32, %v177_v31  ;;  %v180_v36 = vshll.u32 %v333_v35, %v177_v31  ;;  %v183_v38 = vshll.u32 %v334_v37, %v177_v31  ;;  %v186_v42 = vshll.u32 %v335_v40, %v177_v31 }
  0xa5   :  { %v189_v45 = vshll.u32 %v336_v43, %v177_v31  ;;  %v192_v48 = vshll.u32 %v337_v46, %v177_v31  ;;  %vm195_vm2 = vcmp.lt.s32.totalorder %v369_v34, 1  ;;  %vm198_vm3 = vcmp.lt.s32.totalorder %v369_v34, 4 }
  0xa6   :  { %v181_v39 = vshrl.u32 %v334_v37, %v367_v32  ;;  %v184_v41 = vshrl.u32 %v335_v40, %v367_v32  ;;  %v187_v44 = vshrl.u32 %v336_v43, %v367_v32  ;;  %v190_v47 = vshrl.u32 %v337_v46, %v367_v32 }
  0xa7   :  { %v193_v50 = vshrl.u32 %v338_v49, %v367_v32  ;;  %vm197_vm4 = vcmp.lt.s32.totalorder %v369_v34, 3  ;;  %vm196_vm5 = vcmp.lt.s32.totalorder %v369_v34, 2  ;;  %v179_v30 = vshrl.u32 %v333_v35, %v367_v32 }
  0xa8   :  { %v182_v51 = vor.u32 %v181_v39, %v180_v36  ;;  %v185_v52 = vor.u32 %v184_v41, %v183_v38  ;;  %v188_v53 = vor.u32 %v187_v44, %v186_v42  ;;  %v191_v54 = vor.u32 %v190_v47, %v189_v45 }
  0xa9   :  { %v194_v55 = vor.u32 %v193_v50, %v192_v48 }
  0xaa   :  { %v203_v57 = vsel %vm195_vm2, %v182_v51, %v185_v52  ;;  %v207_v58 = vsel %vm195_vm2, %v185_v52, %v188_v53  ;;  %v204_v59 = vsel %vm198_vm3, %v191_v54, 920167782  ;;  %v200_v26 = vsel %vm198_vm3, %v188_v53, 2102212464 }
  0xab   :  { %v208_v60 = vsel %vm198_vm3, %v194_v55, 1326507024  ;;  %v205_v61 = vsel %vm197_vm4, %v188_v53, %v204_v59  ;;  %v199_v39 = vsel %vm195_vm2, %v179_v30, %v182_v51  ;;  %v201_v40 = vsel %vm197_vm4, %v185_v52, %v200_v26 }
  0xac   :  { %v209_v62 = vsel %vm197_vm4, %v191_v54, %v208_v60  ;;  %v206_v63 = vsel %vm196_vm5, %v203_v57, %v205_v61  ;;  %v202_v32 = vsel %vm196_vm5, %v199_v39, %v201_v40  ;;  %vm306_vm2 = vweird.f32 %v361_v23 }
  0xad   :  { %v210_v0 = vsel %vm196_vm5, %v207_v58, %v209_v62  ;;  %v236_v5 = vand.u32 65535, %v206_v63  ;;  %v237_v6 = vshrl.u32 %v206_v63, 16  ;;  %v256_v48 = vmul.u32 %v378_v56, %v202_v32 }
  0xae   :  { %v214_v3 = vand.u32 65535, %v210_v0  ;;  %v215_v4 = vshrl.u32 %v210_v0, 16 }
  0xaf   :  { %v239_v9 = vmul.u32 %v237_v6, %v212_v1  ;;  %v240_v10 = vmul.u32 %v236_v5, %v213_v2  ;;  %v238_v14 = vmul.u32 %v236_v5, %v212_v1  ;;  %v241_v18 = vmul.u32 %v237_v6, %v213_v2 }
  0xb0   :  { %v217_v7 = vmul.u32 %v215_v4, %v212_v1  ;;  %v218_v8 = vmul.u32 %v214_v3, %v213_v2  ;;  %v216_v11 = vmul.u32 %v214_v3, %v212_v1  ;;  %v219_v13 = vmul.u32 %v215_v4, %v213_v2 }
  0xb1   :  { %v242_v15 = vshll.u32 %v239_v9, 16  ;;  %v244_v21 = vshll.u32 %v240_v10, 16  ;;  %v243_v37 = vshrl.u32 %v239_v9, 16  ;;  %v245_v43 = vshrl.u32 %v240_v10, 16 }
  0xb2   :  { %v220_v12 = vshll.u32 %v217_v7, 16  ;;  %v222_v16 = vshll.u32 %v218_v8, 16  ;;  %v221_v31 = vshrl.u32 %v217_v7, 16  ;;  %v223_v41 = vshrl.u32 %v218_v8, 16 }
  0xb3   :  { %vm246_vm7 = vc.u32 %v238_v14, %v242_v15  ;;  %v248_v22 = vadd.s32 %v242_v15, %v238_v14 }
  0xb4   :  { %vm224_vm6 = vc.u32 %v216_v11, %v220_v12  ;;  %v226_v17 = vadd.s32 %v220_v12, %v216_v11  ;;  %v247_v25 = vsel %vm246_vm7, 1, %v339_v19 }
  0xb5   :  { %v225_v20 = vsel %vm224_vm6, 1, %v339_v19  ;;  %v249_v29 = vadd.s32 %v247_v25, %v241_v18  ;;  %vm250_vm9 = vc.u32 %v248_v22, %v244_v21  ;;  %v252_v46 = vadd.s32 %v248_v22, %v244_v21 }
  0xb6   :  { %v227_v24 = vadd.s32 %v225_v20, %v219_v13  ;;  %vm228_vm8 = vc.u32 %v226_v17, %v222_v16  ;;  %v251_v36 = vsel %vm250_vm9, 1, %v339_v19 }
  0xb7   :  { %v229_v28 = vsel %vm228_vm8, 1, %v339_v19  ;;  %v253_v38 = vadd.s32 %v251_v36, %v249_v29 }
  0xb8   :  { %v231_v33 = vadd.s32 %v229_v28, %v227_v24 }
  0xb9   :  { %v254_v44 = vadd.s32 %v253_v38, %v243_v37 }
  0xba   :  { %v232_v42 = vadd.s32 %v231_v33, %v221_v31 }
  0xbb   :  { %v255_v35 = vadd.s32 %v254_v44, %v245_v43 }
  0xbc   :  { %v233_v45 = vadd.s32 %v232_v42, %v223_v41 }
  0xbd   :  { %v259_v47 = vadd.s32 1, %v255_v35 }
  0xbe   :  { %vm258_vm10 = vc.u32 %v233_v45, %v252_v46  ;;  %v257_v34 = vadd.s32 %v252_v46, %v233_v45 }
  0xbf   :  { %v260_v49 = vsel %vm258_vm10, %v259_v47, %v255_v35 }
  0xc0   :  { %v261_v50 = vadd.s32 %v260_v49, %v256_v48 }
  0xc2   :  { %v262_v51 = vadd.s32 536870912, %v261_v50 }
  0xc4   :  { %v263_v53 = vshrl.u32 %v262_v51, 30 }
  0xc6   :  { %v264_v54 = vshll.u32 %v263_v53, 30  ;;  %v287_v9 = vsub.s32 4, %v263_v53 }
  0xc8   :  { %v265_v52 = vsub.s32 %v261_v50, %v264_v54  ;;  %v288_v14 = vsel %vm165_vm13, %v287_v9, %v263_v53 }
  0xc9   :  { %v290_v17 = vsel %vm164_vm14, 0, %v288_v14 }
  0xca   :  { %vm266_vm11 = vcmp.lt.s32.totalorder %v265_v52, 0  ;;  %v267_v55 = vsub.s32 0, %v265_v52  ;;  %v307_v22 = vadd.s32 3, %v290_v17 }
  0xcc   :  { %v268_v57 = vsel %vm266_vm11, %v267_v55, %v265_v52  ;;  %v308_v28 = vand.u32 3, %v307_v22 }
  0xcd   :  { %v269_v58 = vclz %v268_v57 }
  0xce   :  { %vm310_vm15 = vcmp.eq.s32.totalorder %v308_v28, 0  ;;  %vm313_vm0 = vcmp.eq.s32.totalorder %v308_v28, 2  ;;  %vm309_vm1 = vcmp.lt.s32.totalorder %v308_v28, 2 }
  0xcf   :  { %v324_v59 = vadd.s32 4294967294, %v269_v58 }
  0xd1   :  { %vm325_vm12 = vcmp.lt.s32.totalorder %v324_v59, 0 }
  0xd2   :  { %v272_v60 = vsel %vm325_vm12, 0, %v324_v59 }
  0xd3   :  { %v273_v61 = vsub.s32 32, %v272_v60  ;;  %v277_v62 = vsub.s32 4294967266, %v272_v60  ;;  %v274_v63 = vshll.u32 %v265_v52, %v272_v60 }
  0xd5   :  { %v275_v0 = vshrl.u32 %v257_v34, %v273_v61  ;;  %v278_v1 = vadd.s32 127, %v277_v62 }
  0xd7   :  { %v276_v56 = vor.u32 %v275_v0, %v274_v63  ;;  %v279_v2 = vshll.u32 %v278_v1, 23 }
  0xd9   :  { %v280_v3 = vor.u32 4788187, %v279_v2  ;;  %v283_v5 = vcvt.s32.f32 %v276_v56 }
  0xdb   :  { %v281_v4 = vand.u32 2147483647, %v280_v3 }
  0xdd   :  { %v284_v6 = vmul.f32 %v283_v5, %v281_v4 }
  0xdf   :  { %v285_v7 = vxor.u32 2147483648, %v284_v6 }
  0xe1   :  { %v286_v8 = vsel %vm165_vm13, %v285_v7, %v284_v6 }
  0xe2   :  { %v289_v10 = vsel %vm164_vm14, %v361_v23, %v286_v8 }
  0xe3   :  { %v291_v11 = vmul.f32 %v289_v10, %v289_v10 }
  0xe5   :  { %v292_v12 = vmul.f32 -0.001358992, %v291_v11  ;;  %v299_v13 = vmul.f32 -0.00019511016, %v291_v11 }
  0xe7   :  { %v293_v15 = vadd.f32 0.041655596, %v292_v12  ;;  %v300_v16 = vadd.f32 0.008332121, %v299_v13 }
  0xe9   :  { %v294_v18 = vmul.f32 %v293_v15, %v291_v11  ;;  %v301_v19 = vmul.f32 %v300_v16, %v291_v11 }
  0xeb   :  { %v295_v20 = vadd.f32 -0.4999988, %v294_v18  ;;  %v302_v21 = vadd.f32 -0.16666654, %v301_v19 }
  0xed   :  { %v296_v24 = vmul.f32 %v295_v20, %v291_v11  ;;  %v303_v25 = vmul.f32 %v302_v21, %v291_v11 }
  0xef   :  { %v297_v26 = vadd.f32 1.0, %v296_v24  ;;  %v304_v27 = vadd.f32 1.0, %v303_v25 }
  0xf1   :  { %v305_v29 = vmul.f32 %v304_v27, %v289_v10  ;;  %v314_v30 = vxor.u32 2147483648, %v297_v26 }
  0xf3   :  { %v311_v31 = vxor.u32 2147483648, %v305_v29  ;;  %v315_v36 = vsel %vm313_vm0, %v314_v30, %v305_v29 }
  0xf5   :  { %v312_v33 = vsel %vm310_vm15, %v297_v26, %v311_v31 }
  0xf6   :  { %v316_v37 = vsel %vm309_vm1, %v312_v33, %v315_v36 }
  0xf7   :  { %v317_v38 = vsel %vm306_vm2, nan, %v316_v37 }
  0xf8   :  { %318 = vst [vmem:[%s422_s2] sm:$0x3] %v317_v38 }

</bundles_post_ra>
